<compile_context>
chip_gen: v7x
topology: tpu7x:2x2x1
jax: 0.10.0
libtpu: 0.0.40
codegen_flags: <defaults>
</compile_context>

<pallas_src>
import functools

import jax
import jax.numpy as jnp
from jax import lax
from jax.experimental import pallas as pl
from jax.experimental.pallas import tpu as pltpu


def _convt_in_relu_kernel(xw_ref, w_ref, out_ref, *, eps):
    """One batch element x one Cout tile: transposed conv + InstanceNorm + ReLU.

    xw_ref : (1, H+2, W, 3*Cin)      W-axis im2col of the zero-padded input
    w_ref  : (1, 2, 2, 3*Cin, 2*tc)  [cout_tile, py, dy, k=(ox,ci), (px, co)]
    out_ref: (1, 2, H, 1, W, 2*tc)   [n, py, m, cout_tile, w, (px, co)]
    """
    H = out_ref.shape[2]
    W = out_ref.shape[4]
    c2 = out_ref.shape[5]
    tc = c2 // 2
    count = 4.0 * H * W                       # stats over the full 2H x 2W extent
    dn = (((2,), (0,)), ((), ()))             # contract last lhs dim with rhs dim 0

    # ---- pass 1: transposed conv.  Per (py, dy) one matmul covering both kx
    # taps, both px parities and the whole Cout tile.  Only the leading H axis
    # is sliced (cheap); raw results are staged into out_ref so a single f32
    # accumulator is live at a time.
    sums = jnp.zeros((1, 1, c2), jnp.float32)
    for py in range(2):
        acc = lax.dot_general(xw_ref[0, py:py + H], w_ref[0, py, 0], dn,
                              preferred_element_type=jnp.float32)
        acc = acc + lax.dot_general(xw_ref[0, py + 1:py + 1 + H], w_ref[0, py, 1],
                                    dn, preferred_element_type=jnp.float32)
        out_ref[0, py, :, 0, :, :] = acc
        sums = sums + jnp.sum(acc, axis=(0, 1), keepdims=True)

    # Lanes are ordered (px, co): per-channel stats need the two px halves
    # combined and re-broadcast.  One tiny matmul against the constant
    # pair-sum matrix [[I, I], [I, I]] does both (no lane shuffles/slices).
    row = lax.broadcasted_iota(jnp.int32, (c2, c2), 0)
    col = lax.broadcasted_iota(jnp.int32, (c2, c2), 1)
    pair = (row % tc == col % tc).astype(jnp.float32)

    mean = lax.dot_general(sums, pair, dn,
                           preferred_element_type=jnp.float32) * (1.0 / count)

    # ---- pass 2: centered (two-pass) variance over the staged raw output ----
    ssq = jnp.zeros((1, 1, c2), jnp.float32)
    for py in range(2):
        d = out_ref[0, py, :, 0, :, :] - mean
        ssq = ssq + jnp.sum(d * d, axis=(0, 1), keepdims=True)
    var = lax.dot_general(ssq, pair, dn,
                          preferred_element_type=jnp.float32) * (1.0 / count)
    inv = lax.rsqrt(var + eps)

    # ---- pass 3: normalize + ReLU, overwriting the staged values in place ----
    for py in range(2):
        y = (out_ref[0, py, :, 0, :, :] - mean) * inv
        out_ref[0, py, :, 0, :, :] = jnp.maximum(y, 0.0)


def _pick_cout_tile(cout, cap=128):
    t = min(cout, cap)
    while cout % t:
        t -= 1
    return t


def unet_up_forward(x_nchw, skip_nchw, weight):
    """UNetUp.forward.
    x_nchw: (N, Cin, H, W); skip_nchw: (N, Cs, 2H, 2W);
    weight: (Cin, Cout, 4, 4) in torch.nn.ConvTranspose2d layout."""
    N, Cin, H, W = x_nchw.shape
    Cout = weight.shape[1]
    Hp = H + 2
    tc = _pick_cout_tile(Cout)
    n_ct = Cout // tc

    # TODO(synk): the F.interpolate(bilinear) fallback of UNetUp is only taken
    # when skip spatial != 2x the upsampled spatial; standard UNet never hits it.
    assert skip_nchw.shape[0] == N and skip_nchw.shape[2:] == (2 * H, 2 * W), \
        "bilinear-resize fallback not implemented"

    # ---- input: NHWC + 1-pixel zero ring + im2col over the W/kx axis.  Under
    # jit this is one fused producer (no standalone pad pass); model dtype kept.
    x = jnp.transpose(x_nchw, (0, 2, 3, 1))                    # (N, H, W, Cin)
    xpad = jnp.pad(x, ((0, 0), (1, 1), (1, 1), (0, 0)))        # (N, Hp, Wp, Cin)
    xw = jnp.concatenate([xpad[:, :, ox:ox + W, :] for ox in range(3)], axis=-1)
    # xw[n, i, j, ox*Cin + c] == xpad[n, i, j + ox, c]           (N, Hp, W, 3*Cin)

    # ---- weight: fold kx taps into K = 3*Cin (zero block for the unused ox)
    # and both px parities + a Cout tile into the columns:
    #   wk[j, py, dy, ox*Cin + ci, px*tc + t] = w4[3-py-2dy, 3-px-2dx, ci, j*tc+t]
    w4 = jnp.transpose(weight, (2, 3, 0, 1))                   # (ky, kx, Cin, Cout)
    wk = jnp.zeros((2, 2, 3 * Cin, 2, Cout), weight.dtype)
    for py in range(2):
        for dy in range(2):
            for px in range(2):
                for dx in range(2):
                    ox = px + dx
                    wk = wk.at[py, dy, ox * Cin:(ox + 1) * Cin, px, :].set(
                        w4[3 - py - 2 * dy, 3 - px - 2 * dx])
    wk = wk.reshape(2, 2, 3 * Cin, 2, n_ct, tc)
    wk = jnp.transpose(wk, (4, 0, 1, 2, 3, 5)).reshape(n_ct, 2, 2, 3 * Cin, 2 * tc)

    kernel = functools.partial(_convt_in_relu_kernel, eps=1e-5)
    out = pl.pallas_call(
        kernel,
        out_shape=jax.ShapeDtypeStruct((N, 2, H, n_ct, W, 2 * tc), jnp.float32),
        grid_spec=pltpu.PrefetchScalarGridSpec(
            num_scalar_prefetch=0,
            grid=(N, n_ct),                      # batch x Cout-tile, both parallel
            in_specs=[
                pl.BlockSpec((1, Hp, W, 3 * Cin), lambda n, j: (n, 0, 0, 0)),
                pl.BlockSpec((1, 2, 2, 3 * Cin, 2 * tc),
                             lambda n, j: (j, 0, 0, 0, 0)),
            ],
            out_specs=pl.BlockSpec((1, 2, H, 1, W, 2 * tc),
                                   lambda n, j: (n, 0, 0, j, 0, 0)),
        ),
        compiler_params=pltpu.CompilerParams(
            dimension_semantics=("parallel", "parallel"),
            vmem_limit_bytes=48 * 1024 * 1024),
    )(xw, wk)

    # ---- reassembly: parity interleave + NHWC->NCHW as ONE transpose ---------
    # out axes (n, py, m, j, w, px*tc+t)  ->  NCHW (n, j*tc+t, 2m+py, 2w+px)
    y = out.reshape(N, 2, H, n_ct, W, 2, tc)
    y = jnp.transpose(y, (0, 3, 6, 2, 1, 4, 5)).reshape(N, Cout, 2 * H, 2 * W)

    # channel concat directly in NCHW (skip stays in its native layout)
    return jnp.concatenate([y, skip_nchw.astype(y.dtype)], axis=1)


def unet_up_reference(x_nchw, skip_nchw, weight):
    """Pure-JAX reference (transposed conv as lhs-dilated conv)."""
    w_conv = jnp.flip(jnp.transpose(weight, (1, 0, 2, 3)), axis=(2, 3))  # OIHW
    y = lax.conv_general_dilated(
        x_nchw, w_conv, window_strides=(1, 1),
        padding=((2, 2), (2, 2)), lhs_dilation=(2, 2),
        dimension_numbers=('NCHW', 'OIHW', 'NCHW'),
        precision=lax.Precision.HIGHEST)
    mean = jnp.mean(y, axis=(2, 3), keepdims=True)
    var = jnp.var(y, axis=(2, 3), keepdims=True)
    y = jnp.maximum((y - mean) * lax.rsqrt(var + 1e-5), 0.0)
    return jnp.concatenate([y, skip_nchw], axis=1)


if __name__ == "__main__":
    key = jax.random.PRNGKey(0)
    k1, k2, k3 = jax.random.split(key, 3)

    N, Cin, H, W = 2, 8, 8, 8        # in_size = 8
    Cout, Cskip = 4, 4               # out_size = 4, skip has 4 channels
    x = jax.random.normal(k1, (N, Cin, H, W), jnp.float32)
    skip = jax.random.normal(k2, (N, Cskip, 2 * H, 2 * W), jnp.float32)
    # deterministic synthetic ConvTranspose2d weight: (in, out, kH, kW)
    weight = jax.random.normal(k3, (Cin, Cout, 4, 4), jnp.float32) * 0.1

    fwd = jax.jit(unet_up_forward)
    out = jax.block_until_ready(fwd(x, skip, weight))
    ref = unet_up_reference(x, skip, weight)

    assert out.shape == (N, Cout + Cskip, 2 * H, 2 * W), out.shape
    assert jnp.allclose(out, ref, atol=1e-3, rtol=1e-3), \
        float(jnp.max(jnp.abs(out - ref)))
    print("KERNEL_OK")
</pallas_src>

<mosaic_0001>
module attributes {stable_mosaic.version = 11 : i64} {
  func.func @_convt_in_relu_kernel(%arg0: i32, %arg1: i32, %arg2: memref<1x10x8x24xf32, #tpu.memory_space<vmem>>, %arg3: memref<1x2x2x24x8xf32, #tpu.memory_space<vmem>>, %arg4: memref<1x2x8x1x8x8xf32, #tpu.memory_space<vmem>>) attributes {dimension_semantics = [#tpu.dimension_semantics<parallel>, #tpu.dimension_semantics<parallel>], iteration_bounds = array<i64: 2, 1>, scalar_prefetch = 0 : i64, scratch_operands = 0 : i64, tpu.core_type = #tpu.core_type<tc>, window_params = [{transform_indices = @transform_0, window_bounds = array<i64: 1, 10, 8, 24>}, {transform_indices = @transform_1, window_bounds = array<i64: 1, 2, 2, 24, 8>}, {transform_indices = @transform_2, window_bounds = array<i64: 1, 2, 8, 1, 8, 8>}]} {
    %cst = arith.constant 0.000000e+00 : f32
    %0 = vector.broadcast %cst : f32 to vector<1x1x8xf32>
    %c0 = arith.constant 0 : index
    %c0_0 = arith.constant 0 : index
    %c0_1 = arith.constant 0 : index
    %c0_2 = arith.constant 0 : index
    %1 = vector.load %arg2[%c0, %c0_0, %c0_1, %c0_2] : memref<1x10x8x24xf32, #tpu.memory_space<vmem>>, vector<1x8x8x24xf32>
    %2 = vector.shape_cast %1 : vector<1x8x8x24xf32> to vector<8x8x24xf32>
    %c0_3 = arith.constant 0 : index
    %c0_4 = arith.constant 0 : index
    %c0_5 = arith.constant 0 : index
    %c0_6 = arith.constant 0 : index
    %c0_7 = arith.constant 0 : index
    %3 = vector.load %arg3[%c0_3, %c0_4, %c0_5, %c0_6, %c0_7] : memref<1x2x2x24x8xf32, #tpu.memory_space<vmem>>, vector<1x1x1x24x8xf32>
    %4 = vector.shape_cast %3 : vector<1x1x1x24x8xf32> to vector<24x8xf32>
    %cst_8 = arith.constant dense<0.000000e+00> : vector<8x8x8xf32>
    %5 = tpu.matmul %2, %4, %cst_8 {dimension_numbers = #tpu.dot_dimension_numbers<[2], [0], [0, 1], [1], [0, 0, 0, 1, 1, 1], [], []>} : vector<8x8x24xf32>, vector<24x8xf32>, vector<8x8x8xf32> -> vector<8x8x8xf32>
    %c0_9 = arith.constant 0 : index
    %c1 = arith.constant 1 : index
    %c0_10 = arith.constant 0 : index
    %c0_11 = arith.constant 0 : index
    %6 = vector.load %arg2[%c0_9, %c1, %c0_10, %c0_11] : memref<1x10x8x24xf32, #tpu.memory_space<vmem>>, vector<1x8x8x24xf32>
    %7 = vector.shape_cast %6 : vector<1x8x8x24xf32> to vector<8x8x24xf32>
    %c0_12 = arith.constant 0 : index
    %c0_13 = arith.constant 0 : index
    %c1_14 = arith.constant 1 : index
    %c0_15 = arith.constant 0 : index
    %c0_16 = arith.constant 0 : index
    %8 = vector.load %arg3[%c0_12, %c0_13, %c1_14, %c0_15, %c0_16] : memref<1x2x2x24x8xf32, #tpu.memory_space<vmem>>, vector<1x1x1x24x8xf32>
    %9 = vector.shape_cast %8 : vector<1x1x1x24x8xf32> to vector<24x8xf32>
    %cst_17 = arith.constant dense<0.000000e+00> : vector<8x8x8xf32>
    %10 = tpu.matmul %7, %9, %cst_17 {dimension_numbers = #tpu.dot_dimension_numbers<[2], [0], [0, 1], [1], [0, 0, 0, 1, 1, 1], [], []>} : vector<8x8x24xf32>, vector<24x8xf32>, vector<8x8x8xf32> -> vector<8x8x8xf32>
    %11 = arith.addf %5, %10 : vector<8x8x8xf32>
    %c0_18 = arith.constant 0 : index
    %c0_19 = arith.constant 0 : index
    %c0_20 = arith.constant 0 : index
    %c0_21 = arith.constant 0 : index
    %c0_22 = arith.constant 0 : index
    %c0_23 = arith.constant 0 : index
    %12 = vector.load %arg4[%c0_18, %c0_19, %c0_20, %c0_21, %c0_22, %c0_23] : memref<1x2x8x1x8x8xf32, #tpu.memory_space<vmem>>, vector<1x1x8x1x8x8xf32>
    %13 = vector.shape_cast %12 : vector<1x1x8x1x8x8xf32> to vector<8x8x8xf32>
    %14 = vector.shape_cast %11 : vector<8x8x8xf32> to vector<1x1x8x1x8x8xf32>
    tpu.vector_store %arg4[%c0_18, %c0_19, %c0_20, %c0_21, %c0_22, %c0_23], %14 {strides = array<i32>} : memref<1x2x8x1x8x8xf32, #tpu.memory_space<vmem>>, vector<1x1x8x1x8x8xf32>,
    %cst_24 = arith.constant dense<0.000000e+00> : vector<8xf32>
    %15 = vector.multi_reduction <add>, %11, %cst_24 [0, 1] : vector<8x8x8xf32> to vector<8xf32>
    %16 = vector.shape_cast %15 : vector<8xf32> to vector<1x1x8xf32>
    %17 = arith.addf %0, %16 : vector<1x1x8xf32>
    %c0_25 = arith.constant 0 : index
    %c1_26 = arith.constant 1 : index
    %c0_27 = arith.constant 0 : index
    %c0_28 = arith.constant 0 : index
    %18 = vector.load %arg2[%c0_25, %c1_26, %c0_27, %c0_28] : memref<1x10x8x24xf32, #tpu.memory_space<vmem>>, vector<1x8x8x24xf32>
    %19 = vector.shape_cast %18 : vector<1x8x8x24xf32> to vector<8x8x24xf32>
    %c0_29 = arith.constant 0 : index
    %c1_30 = arith.constant 1 : index
    %c0_31 = arith.constant 0 : index
    %c0_32 = arith.constant 0 : index
    %c0_33 = arith.constant 0 : index
    %20 = vector.load %arg3[%c0_29, %c1_30, %c0_31, %c0_32, %c0_33] : memref<1x2x2x24x8xf32, #tpu.memory_space<vmem>>, vector<1x1x1x24x8xf32>
    %21 = vector.shape_cast %20 : vector<1x1x1x24x8xf32> to vector<24x8xf32>
    %cst_34 = arith.constant dense<0.000000e+00> : vector<8x8x8xf32>
    %22 = tpu.matmul %19, %21, %cst_34 {dimension_numbers = #tpu.dot_dimension_numbers<[2], [0], [0, 1], [1], [0, 0, 0, 1, 1, 1], [], []>} : vector<8x8x24xf32>, vector<24x8xf32>, vector<8x8x8xf32> -> vector<8x8x8xf32>
    %c0_35 = arith.constant 0 : index
    %c2 = arith.constant 2 : index
    %c0_36 = arith.constant 0 : index
    %c0_37 = arith.constant 0 : index
    %23 = vector.load %arg2[%c0_35, %c2, %c0_36, %c0_37] : memref<1x10x8x24xf32, #tpu.memory_space<vmem>>, vector<1x8x8x24xf32>
    %24 = vector.shape_cast %23 : vector<1x8x8x24xf32> to vector<8x8x24xf32>
    %c0_38 = arith.constant 0 : index
    %c1_39 = arith.constant 1 : index
    %c1_40 = arith.constant 1 : index
    %c0_41 = arith.constant 0 : index
    %c0_42 = arith.constant 0 : index
    %25 = vector.load %arg3[%c0_38, %c1_39, %c1_40, %c0_41, %c0_42] : memref<1x2x2x24x8xf32, #tpu.memory_space<vmem>>, vector<1x1x1x24x8xf32>
    %26 = vector.shape_cast %25 : vector<1x1x1x24x8xf32> to vector<24x8xf32>
    %cst_43 = arith.constant dense<0.000000e+00> : vector<8x8x8xf32>
    %27 = tpu.matmul %24, %26, %cst_43 {dimension_numbers = #tpu.dot_dimension_numbers<[2], [0], [0, 1], [1], [0, 0, 0, 1, 1, 1], [], []>} : vector<8x8x24xf32>, vector<24x8xf32>, vector<8x8x8xf32> -> vector<8x8x8xf32>
    %28 = arith.addf %22, %27 : vector<8x8x8xf32>
    %c0_44 = arith.constant 0 : index
    %c1_45 = arith.constant 1 : index
    %c0_46 = arith.constant 0 : index
    %c0_47 = arith.constant 0 : index
    %c0_48 = arith.constant 0 : index
    %c0_49 = arith.constant 0 : index
    %29 = vector.load %arg4[%c0_44, %c1_45, %c0_46, %c0_47, %c0_48, %c0_49] : memref<1x2x8x1x8x8xf32, #tpu.memory_space<vmem>>, vector<1x1x8x1x8x8xf32>
    %30 = vector.shape_cast %29 : vector<1x1x8x1x8x8xf32> to vector<8x8x8xf32>
    %31 = vector.shape_cast %28 : vector<8x8x8xf32> to vector<1x1x8x1x8x8xf32>
    tpu.vector_store %arg4[%c0_44, %c1_45, %c0_46, %c0_47, %c0_48, %c0_49], %31 {strides = array<i32>} : memref<1x2x8x1x8x8xf32, #tpu.memory_space<vmem>>, vector<1x1x8x1x8x8xf32>,
    %cst_50 = arith.constant dense<0.000000e+00> : vector<8xf32>
    %32 = vector.multi_reduction <add>, %28, %cst_50 [0, 1] : vector<8x8x8xf32> to vector<8xf32>
    %33 = vector.shape_cast %32 : vector<8xf32> to vector<1x1x8xf32>
    %34 = arith.addf %17, %33 : vector<1x1x8xf32>
    %35 = tpu.iota {dimensions = array<i32: 0>} : vector<8x8xi32>
    %36 = tpu.iota {dimensions = array<i32: 1>} : vector<8x8xi32>
    %c4_i32 = arith.constant 4 : i32
    %c0_i32 = arith.constant 0 : i32
    %37 = arith.cmpi eq, %c4_i32, %c0_i32 : i32
    %c1_i32 = arith.constant 1 : i32
    %38 = arith.select %37, %c1_i32, %c4_i32 : i32
    %39 = vector.broadcast %38 : i32 to vector<8x8xi32>
    %40 = arith.remsi %35, %39 : vector<8x8xi32>
    %c0_i32_51 = arith.constant 0 : i32
    %41 = vector.broadcast %c0_i32_51 : i32 to vector<8x8xi32>
    %42 = arith.cmpi ne, %40, %41 : vector<8x8xi32>
    %c0_i32_52 = arith.constant 0 : i32
    %43 = vector.broadcast %c0_i32_52 : i32 to vector<8x8xi32>
    %44 = arith.cmpi slt, %40, %43 : vector<8x8xi32>
    %c0_i32_53 = arith.constant 0 : i32
    %45 = arith.cmpi slt, %38, %c0_i32_53 : i32
    %46 = vector.broadcast %45 : i1 to vector<8x8xi1>
    %47 = vector.broadcast %46 : vector<8x8xi1> to vector<8x8xi1>
    %48 = arith.xori %44, %47 : vector<8x8xi1>
    %49 = arith.andi %48, %42 : vector<8x8xi1>
    %50 = vector.broadcast %38 : i32 to vector<8x8xi32>
    %51 = arith.addi %40, %50 : vector<8x8xi32>
    %52 = arith.select %49, %51, %40 : vector<8x8xi1>, vector<8x8xi32>
    %c4_i32_54 = arith.constant 4 : i32
    %c0_i32_55 = arith.constant 0 : i32
    %53 = arith.cmpi eq, %c4_i32_54, %c0_i32_55 : i32
    %c1_i32_56 = arith.constant 1 : i32
    %54 = arith.select %53, %c1_i32_56, %c4_i32_54 : i32
    %55 = vector.broadcast %54 : i32 to vector<8x8xi32>
    %56 = arith.remsi %36, %55 : vector<8x8xi32>
    %c0_i32_57 = arith.constant 0 : i32
    %57 = vector.broadcast %c0_i32_57 : i32 to vector<8x8xi32>
    %58 = arith.cmpi ne, %56, %57 : vector<8x8xi32>
    %c0_i32_58 = arith.constant 0 : i32
    %59 = vector.broadcast %c0_i32_58 : i32 to vector<8x8xi32>
    %60 = arith.cmpi slt, %56, %59 : vector<8x8xi32>
    %c0_i32_59 = arith.constant 0 : i32
    %61 = arith.cmpi slt, %54, %c0_i32_59 : i32
    %62 = vector.broadcast %61 : i1 to vector<8x8xi1>
    %63 = vector.broadcast %62 : vector<8x8xi1> to vector<8x8xi1>
    %64 = arith.xori %60, %63 : vector<8x8xi1>
    %65 = arith.andi %64, %58 : vector<8x8xi1>
    %66 = vector.broadcast %54 : i32 to vector<8x8xi32>
    %67 = arith.addi %56, %66 : vector<8x8xi32>
    %68 = arith.select %65, %67, %56 : vector<8x8xi1>, vector<8x8xi32>
    %69 = arith.cmpi eq, %52, %68 : vector<8x8xi32>
    %70 = arith.extui %69 : vector<8x8xi1> to vector<8x8xi32>
    %71 = arith.sitofp %70 : vector<8x8xi32> to vector<8x8xf32>
    %cst_60 = arith.constant dense<0.000000e+00> : vector<1x1x8xf32>
    %72 = tpu.matmul %34, %71, %cst_60 {dimension_numbers = #tpu.dot_dimension_numbers<[2], [0], [0, 1], [1], [0, 0, 0, 1, 1, 1], [], []>} : vector<1x1x8xf32>, vector<8x8xf32>, vector<1x1x8xf32> -> vector<1x1x8xf32>
    %cst_61 = arith.constant 3.906250e-03 : f32
    %73 = vector.broadcast %cst_61 : f32 to vector<1x1x8xf32>
    %74 = arith.mulf %72, %73 : vector<1x1x8xf32>
    %cst_62 = arith.constant 0.000000e+00 : f32
    %75 = vector.broadcast %cst_62 : f32 to vector<1x1x8xf32>
    %c0_63 = arith.constant 0 : index
    %c0_64 = arith.constant 0 : index
    %c0_65 = arith.constant 0 : index
    %c0_66 = arith.constant 0 : index
    %c0_67 = arith.constant 0 : index
    %c0_68 = arith.constant 0 : index
    %76 = vector.load %arg4[%c0_63, %c0_64, %c0_65, %c0_66, %c0_67, %c0_68] : memref<1x2x8x1x8x8xf32, #tpu.memory_space<vmem>>, vector<1x1x8x1x8x8xf32>
    %77 = vector.shape_cast %76 : vector<1x1x8x1x8x8xf32> to vector<8x8x8xf32>
    %78 = vector.broadcast %74 : vector<1x1x8xf32> to vector<8x8x8xf32>
    %79 = arith.subf %77, %78 : vector<8x8x8xf32>
    %80 = arith.mulf %79, %79 : vector<8x8x8xf32>
    %cst_69 = arith.constant dense<0.000000e+00> : vector<8xf32>
    %81 = vector.multi_reduction <add>, %80, %cst_69 [0, 1] : vector<8x8x8xf32> to vector<8xf32>
    %82 = vector.shape_cast %81 : vector<8xf32> to vector<1x1x8xf32>
    %83 = arith.addf %75, %82 : vector<1x1x8xf32>
    %c0_70 = arith.constant 0 : index
    %c1_71 = arith.constant 1 : index
    %c0_72 = arith.constant 0 : index
    %c0_73 = arith.constant 0 : index
    %c0_74 = arith.constant 0 : index
    %c0_75 = arith.constant 0 : index
    %84 = vector.load %arg4[%c0_70, %c1_71, %c0_72, %c0_73, %c0_74, %c0_75] : memref<1x2x8x1x8x8xf32, #tpu.memory_space<vmem>>, vector<1x1x8x1x8x8xf32>
    %85 = vector.shape_cast %84 : vector<1x1x8x1x8x8xf32> to vector<8x8x8xf32>
    %86 = vector.broadcast %74 : vector<1x1x8xf32> to vector<8x8x8xf32>
    %87 = arith.subf %85, %86 : vector<8x8x8xf32>
    %88 = arith.mulf %87, %87 : vector<8x8x8xf32>
    %cst_76 = arith.constant dense<0.000000e+00> : vector<8xf32>
    %89 = vector.multi_reduction <add>, %88, %cst_76 [0, 1] : vector<8x8x8xf32> to vector<8xf32>
    %90 = vector.shape_cast %89 : vector<8xf32> to vector<1x1x8xf32>
    %91 = arith.addf %83, %90 : vector<1x1x8xf32>
    %cst_77 = arith.constant dense<0.000000e+00> : vector<1x1x8xf32>
    %92 = tpu.matmul %91, %71, %cst_77 {dimension_numbers = #tpu.dot_dimension_numbers<[2], [0], [0, 1], [1], [0, 0, 0, 1, 1, 1], [], []>} : vector<1x1x8xf32>, vector<8x8xf32>, vector<1x1x8xf32> -> vector<1x1x8xf32>
    %cst_78 = arith.constant 3.906250e-03 : f32
    %93 = vector.broadcast %cst_78 : f32 to vector<1x1x8xf32>
    %94 = arith.mulf %92, %93 : vector<1x1x8xf32>
    %cst_79 = arith.constant 9.99999974E-6 : f32
    %95 = vector.broadcast %cst_79 : f32 to vector<1x1x8xf32>
    %96 = arith.addf %94, %95 : vector<1x1x8xf32>
    %97 = math.rsqrt %96 : vector<1x1x8xf32>
    %c0_80 = arith.constant 0 : index
    %c0_81 = arith.constant 0 : index
    %c0_82 = arith.constant 0 : index
    %c0_83 = arith.constant 0 : index
    %c0_84 = arith.constant 0 : index
    %c0_85 = arith.constant 0 : index
    %98 = vector.load %arg4[%c0_80, %c0_81, %c0_82, %c0_83, %c0_84, %c0_85] : memref<1x2x8x1x8x8xf32, #tpu.memory_space<vmem>>, vector<1x1x8x1x8x8xf32>
    %99 = vector.shape_cast %98 : vector<1x1x8x1x8x8xf32> to vector<8x8x8xf32>
    %100 = vector.broadcast %74 : vector<1x1x8xf32> to vector<8x8x8xf32>
    %101 = arith.subf %99, %100 : vector<8x8x8xf32>
    %102 = vector.broadcast %97 : vector<1x1x8xf32> to vector<8x8x8xf32>
    %103 = arith.mulf %101, %102 : vector<8x8x8xf32>
    %cst_86 = arith.constant 0.000000e+00 : f32
    %104 = vector.broadcast %cst_86 : f32 to vector<8x8x8xf32>
    %105 = arith.maximumf %103, %104 : vector<8x8x8xf32>
    %c0_87 = arith.constant 0 : index
    %c0_88 = arith.constant 0 : index
    %c0_89 = arith.constant 0 : index
    %c0_90 = arith.constant 0 : index
    %c0_91 = arith.constant 0 : index
    %c0_92 = arith.constant 0 : index
    %106 = vector.load %arg4[%c0_87, %c0_88, %c0_89, %c0_90, %c0_91, %c0_92] : memref<1x2x8x1x8x8xf32, #tpu.memory_space<vmem>>, vector<1x1x8x1x8x8xf32>
    %107 = vector.shape_cast %106 : vector<1x1x8x1x8x8xf32> to vector<8x8x8xf32>
    %108 = vector.shape_cast %105 : vector<8x8x8xf32> to vector<1x1x8x1x8x8xf32>
    tpu.vector_store %arg4[%c0_87, %c0_88, %c0_89, %c0_90, %c0_91, %c0_92], %108 {strides = array<i32>} : memref<1x2x8x1x8x8xf32, #tpu.memory_space<vmem>>, vector<1x1x8x1x8x8xf32>,
    %c0_93 = arith.constant 0 : index
    %c1_94 = arith.constant 1 : index
    %c0_95 = arith.constant 0 : index
    %c0_96 = arith.constant 0 : index
    %c0_97 = arith.constant 0 : index
    %c0_98 = arith.constant 0 : index
    %109 = vector.load %arg4[%c0_93, %c1_94, %c0_95, %c0_96, %c0_97, %c0_98] : memref<1x2x8x1x8x8xf32, #tpu.memory_space<vmem>>, vector<1x1x8x1x8x8xf32>
    %110 = vector.shape_cast %109 : vector<1x1x8x1x8x8xf32> to vector<8x8x8xf32>
    %111 = vector.broadcast %74 : vector<1x1x8xf32> to vector<8x8x8xf32>
    %112 = arith.subf %110, %111 : vector<8x8x8xf32>
    %113 = vector.broadcast %97 : vector<1x1x8xf32> to vector<8x8x8xf32>
    %114 = arith.mulf %112, %113 : vector<8x8x8xf32>
    %cst_99 = arith.constant 0.000000e+00 : f32
    %115 = vector.broadcast %cst_99 : f32 to vector<8x8x8xf32>
    %116 = arith.maximumf %114, %115 : vector<8x8x8xf32>
    %c0_100 = arith.constant 0 : index
    %c1_101 = arith.constant 1 : index
    %c0_102 = arith.constant 0 : index
    %c0_103 = arith.constant 0 : index
    %c0_104 = arith.constant 0 : index
    %c0_105 = arith.constant 0 : index
    %117 = vector.load %arg4[%c0_100, %c1_101, %c0_102, %c0_103, %c0_104, %c0_105] : memref<1x2x8x1x8x8xf32, #tpu.memory_space<vmem>>, vector<1x1x8x1x8x8xf32>
    %118 = vector.shape_cast %117 : vector<1x1x8x1x8x8xf32> to vector<8x8x8xf32>
    %119 = vector.shape_cast %116 : vector<8x8x8xf32> to vector<1x1x8x1x8x8xf32>
    tpu.vector_store %arg4[%c0_100, %c1_101, %c0_102, %c0_103, %c0_104, %c0_105], %119 {strides = array<i32>} : memref<1x2x8x1x8x8xf32, #tpu.memory_space<vmem>>, vector<1x1x8x1x8x8xf32>,
    return
  }
  func.func @transform_0(%arg0: i32, %arg1: i32) -> (i32, i32, i32, i32) {
    %c0_i32 = arith.constant 0 : i32
    %c0_i32_0 = arith.constant 0 : i32
    %c0_i32_1 = arith.constant 0 : i32
    %c0_i32_2 = arith.constant 0 : i32
    return %arg0, %c0_i32, %c0_i32_0, %c0_i32_1 : i32, i32, i32, i32
  }
  func.func @transform_1(%arg0: i32, %arg1: i32) -> (i32, i32, i32, i32, i32) {
    %c0_i32 = arith.constant 0 : i32
    %c0_i32_0 = arith.constant 0 : i32
    %c0_i32_1 = arith.constant 0 : i32
    %c0_i32_2 = arith.constant 0 : i32
    %c0_i32_3 = arith.constant 0 : i32
    return %arg1, %c0_i32, %c0_i32_0, %c0_i32_1, %c0_i32_2 : i32, i32, i32, i32, i32
  }
  func.func @transform_2(%arg0: i32, %arg1: i32) -> (i32, i32, i32, i32, i32, i32) {
    %c0_i32 = arith.constant 0 : i32
    %c0_i32_0 = arith.constant 0 : i32
    %c0_i32_1 = arith.constant 0 : i32
    %c0_i32_2 = arith.constant 0 : i32
    %c0_i32_3 = arith.constant 0 : i32
    return %arg0, %c0_i32, %c0_i32_0, %arg1, %c0_i32_1, %c0_i32_2 : i32, i32, i32, i32, i32, i32
  }
}

</mosaic_0001>

<bundles_post_ra>
// kernel: unet_up_forward.1
= control target key start
LH: loop header
LB: loop body
LE: loop exit
PB: predicated region body
PF: predicated region fallthrough
CT: control target
= control target key end

     0   :  { %s1598_s9 = smov 0   ;;  %s1600_s10 = smov 0   ;;  %s1919_s0 = inlined_call_operand.vmem [shape: f32[2,10,8,24], index: 0, kind: input, shape index: {}]   ;;  %s1920_s1 = inlined_call_operand.vmem [shape: f32[1,2,2,24,8], index: 1, kind: input, shape index: {}]   ;;  %s1921_s2 = inlined_call_operand.vmem [shape: f32[2,2,8,1,8,8], index: 2, kind: output, shape index: {}]  }
   0x1   :  { %s1602_s11 = smov 0  }
   0x2 LB: > { %s24_s12 = sadd.s32 1, %s1574_s10  ;;  %p1255_p0 = scmp.ge.s32.totalorder %s1578_s11, 1  ;;  %s1578_s11 = sphi %s1602_s11, %s12_s11   ;;  %s1574_s10 = sphi %s1600_s10, %s1923_s10   ;;  %s1570_s9 = sphi %s1598_s9, %s1922_s9  }
   0x3   : > { %p26_p1 = scmp.ge.s32.totalorder %s24_s12, 2  ;;  %p136_p2 = scmp.lt.s32.totalorder %s1578_s11, 3 }
   0x5   : > { %s1925_s12 = smov (%p26_p1, %s24_s12), 0  ;;  %p137_p3 = pnand %p1255_p0, %p136_p2 }
   0x6   : > { %v1267_v0 = vld [vmem:[%s1920_s1 + $0x18] sm:$0xff] (!%p137_p3)  ;;  %v1268_v1 = vld [vmem:[%s1920_s1 + $0x20] sm:$0xff] (!%p137_p3)  ;;  %v1305_v2 = vld [vmem:[%s1920_s1 + $0x48] sm:$0xff] (!%p137_p3)  ;;  %p166_p4 = scmp.lt.s32.totalorder (!%p137_p3), %s1570_s9, 1  ;;  %vm208_vm0 = vcmask (!%p137_p3), 195584   ;;  %v812_v26 = vlaneseq (!%p137_p3)  ;;  %v1580_v31 = vmov (!%p137_p3), 0.0  }
   0x7   : > { %140 = sbr.rel (%p137_p3) target bundleno = 774 (0x306), region = 28  ;;  %v1494_v3 = vpack.c.bf16 (!%p137_p3), %v1268_v1, %v1267_v0  ;;  %v1306_v4 = vld [vmem:[%s1920_s1 + $0x50] sm:$0xff] (!%p137_p3)  ;;  %v1269_v6 = vld [vmem:[%s1920_s1 + $0x28] sm:$0xff] (!%p137_p3)  ;;  %v1307_v7 = vld [vmem:[%s1920_s1 + $0x58] sm:$0xff] (!%p137_p3)  ;;  %v1581_v32 = vmov (!%p137_p3), 1.0   ;;  %vm1582_vm2 = vmmov (!%p137_p3), 0  }
   0x8   : > { %v1502_v5 = vpack.c.bf16 (!%p137_p3), %v1306_v4, %v1305_v2  ;;  %v192_v8 = vld [vmem:[%s1920_s1] sm:$0xff] (!%p137_p3)  ;;  %v193_v9 = vld [vmem:[%s1920_s1 + $0x8] sm:$0xff] (!%p137_p3)  ;;  %v1294_v10 = vld [vmem:[%s1920_s1 + $0x30] sm:$0xff] (!%p137_p3)  ;;  %v1702_v27 = vshrl.u32 (!%p137_p3), %v812_v26, 7  ;;  %v815_v28 = vand.u32 (!%p137_p3), 127, %v812_v26  ;;  %vm467_vm3 = vcmask (!%p137_p3), 64512  }
   0x9   : > { %1495 = vmatprep.subr.bf16.mxu0 (!%p137_p3), %v1494_v3  ;;  %v1295_v11 = vld [vmem:[%s1920_s1 + $0x38] sm:$0xff] (!%p137_p3)  ;;  %v1498_v12 = vpack.c.bf16 (!%p137_p3), %v193_v9, %v192_v8  ;;  %v194_v18 = vld [vmem:[%s1920_s1 + $0x10] sm:$0xff] (!%p137_p3)  ;;  %v1296_v21 = vld [vmem:[%s1920_s1 + $0x40] sm:$0xff] (!%p137_p3) }
   0xa   : > { %1503 = vmatprep.subr.bf16.mxu1 (!%p137_p3), %v1502_v5  ;;  %1497 = vmatpush3.bf16.msra.mxu0 (!%p137_p3), %v1494_v3  ;;  %v1506_v15 = vpack.c.bf16 (!%p137_p3), %v1295_v11, %v1294_v10  ;;  %v820_v29 = vand.u32 (!%p137_p3), 3, %v1702_v27  ;;  %v832_v30 = vand.u32 (!%p137_p3), 3, %v815_v28 }
   0xb   : > { %1505 = vmatpush3.bf16.msra.mxu1 (!%p137_p3), %v1502_v5  ;;  %1416 = vmatprep.subr.mxu0 (!%p137_p3), %v1269_v6 }
   0xc   : > { %1452 = vmatprep.subr.mxu1 (!%p137_p3), %v1307_v7  ;;  %vm840_vm1 = vcmp.eq.s32.totalorder (!%p137_p3), %v820_v29, %v832_v30  ;;  %v927_v29 = vsub.s32 (!%p137_p3), 0, %v1702_v27 }
   0xe   : > { %s1927_s9 = smov (!%p166_p4, %s1570_s9), 1  ;;  %1417 = vmatpush3.msra.mxu0 %v1269_v6 }
   0xf   : > { %s1526_s29 = smul.u32 80, %s1927_s9  ;;  %1453 = vmatpush3.msra.mxu1 %v1307_v7  ;;  %1499 = vmatprep.subr.bf16.mxu0 %v1498_v12  ;;  %s1363_s17 = sshll.u32 %s1927_s9, 7 }
  0x10   : > { %1507 = vmatprep.subr.bf16.mxu1 %v1506_v15  ;;  %s1709_s20 = scalar_lea.vmem %s1921_s2, %s1363_s17 }
  0x11   : > { %s1652_s8 = scalar_lea.vmem %s1919_s0, %s1526_s29 }
  0x12   : > { %v1259_v13 = vld [vmem:[%s1652_s8 + $0x8] sm:$0xff]  ;;  %v1297_v14 = vld [vmem:[%s1652_s8 + $0x10] sm:$0xff]  ;;  %v1298_v16 = vld [vmem:[%s1652_s8 + $0x18] sm:$0xff] }
  0x13   : > { %1418 = vmatprep.mubr.msk.f32.mxu0 %vm208_vm0, %v1259_v13  ;;  %1454 = vmatprep.mubr.msk.f32.mxu1 %vm208_vm0, %v1297_v14  ;;  %v1299_v17 = vld [vmem:[%s1652_s8 + $0x20] sm:$0xff]  ;;  %v1300_v19 = vld [vmem:[%s1652_s8 + $0x28] sm:$0xff]  ;;  %v1301_v20 = vld [vmem:[%s1652_s8 + $0x30] sm:$0xff] }
  0x14   : > { %1419 = vmatmul.mubr.msk.f32.vlgmr.msra.gmra.mrb[0].mxu0 %vm208_vm0, %v1297_v14  ;;  %1455 = vmatmul.mubr.msk.f32.vlgmr.msra.gmra.mrb[0].mxu1 %vm208_vm0, %v1298_v16  ;;  %v1302_v22 = vld [vmem:[%s1652_s8 + $0x38] sm:$0xff]  ;;  %v1303_v23 = vld [vmem:[%s1652_s8 + $0x40] sm:$0xff]  ;;  %v1304_v24 = vld [vmem:[%s1652_s8 + $0x48] sm:$0xff] }
  0x15   : > { %1501 = vmatpush3.bf16.msra.mxu0 %v1498_v12  ;;  %1509 = vmatpush3.bf16.msra.mxu1 %v1506_v15  ;;  %v184_v25 = vld [vmem:[%s1652_s8] sm:$0xff] }
  0x16   : > { %1421 = vmatprep.mubr.msk.f32.mxu0 %vm208_vm0, %v1298_v16  ;;  %1457 = vmatprep.mubr.msk.f32.mxu1 %vm208_vm0, %v1299_v17 }
  0x17   : > { %1434 = vmatprep.subr.mxu0 %v194_v18  ;;  %1470 = vmatprep.subr.mxu1 %v1296_v21 }
  0x18   : > { %1422 = vmatmul.mubr.msk.f32.gmra.mrb[2].mxu0 %vm208_vm0, %v1299_v17  ;;  %1458 = vmatmul.mubr.msk.f32.gmra.mrb[2].mxu1 %vm208_vm0, %v1300_v19 }
  0x19   : > { %1424 = vmatprep.mubr.msk.f32.mxu0 %vm208_vm0, %v1300_v19  ;;  %1460 = vmatprep.mubr.msk.f32.mxu1 %vm208_vm0, %v1301_v20 }
  0x1a   : > { %1435 = vmatpush3.msra.mxu0 %v194_v18  ;;  %1471 = vmatpush3.msra.mxu1 %v1296_v21 }
  0x1b   : > { %1484 = vmatprep.subr.mxu0 %v1580_v31  ;;  %1489 = vmatprep.subr.mxu1 %v1580_v31 }
  0x1c   : > { %1425 = vmatmul.mubr.msk.f32.gmra.mrb[4].mxu0 %vm208_vm0, %v1301_v20  ;;  %1461 = vmatmul.mubr.msk.f32.gmra.mrb[4].mxu1 %vm208_vm0, %v1302_v22 }
  0x1d   : > { %1427 = vmatprep.mubr.msk.f32.mxu0 %vm208_vm0, %v1302_v22  ;;  %1463 = vmatprep.mubr.msk.f32.mxu1 %vm208_vm0, %v1303_v23 }
  0x20   : > { %1428 = vmatmul.mubr.msk.f32.gmra.mrb[6].mxu0 %vm208_vm0, %v1303_v23  ;;  %1464 = vmatmul.mubr.msk.f32.gmra.mrb[6].mxu1 %vm208_vm0, %v1304_v24 }
  0x21   : > { %1436 = vmatprep.mubr.msk.f32.mxu0 %vm208_vm0, %v184_v25  ;;  %1472 = vmatprep.mubr.msk.f32.mxu1 %vm208_vm0, %v1259_v13 }
  0x24   : > { %1437 = vmatmul.mubr.msk.f32.vlgmr.msra.gmra.mrb[0].mxu0 %vm208_vm0, %v1259_v13  ;;  %1473 = vmatmul.mubr.msk.f32.vlgmr.msra.gmra.mrb[0].mxu1 %vm208_vm0, %v1297_v14 }
  0x25   : > { %1439 = vmatprep.mubr.msk.f32.mxu0 %vm208_vm0, %v1297_v14  ;;  %1475 = vmatprep.mubr.msk.f32.mxu1 %vm208_vm0, %v1298_v16 }
  0x26   : > { %1485 = vmatpush3.msk.msra.mxu0 %vm840_vm1, %v1581_v32  ;;  %1490 = vmatpush3.msk.msra.mxu1 %vm840_vm1, %v1581_v32 }
  0x28   : > { %1440 = vmatmul.mubr.msk.f32.gmra.mrb[2].mxu0 %vm208_vm0, %v1298_v16  ;;  %1476 = vmatmul.mubr.msk.f32.gmra.mrb[2].mxu1 %vm208_vm0, %v1299_v17 }
  0x29   : > { %1442 = vmatprep.mubr.msk.f32.mxu0 %vm208_vm0, %v1299_v17  ;;  %1478 = vmatprep.mubr.msk.f32.mxu1 %vm208_vm0, %v1300_v19 }
  0x2c   : > { %1443 = vmatmul.mubr.msk.f32.gmra.mrb[4].mxu0 %vm208_vm0, %v1300_v19  ;;  %1479 = vmatmul.mubr.msk.f32.gmra.mrb[4].mxu1 %vm208_vm0, %v1301_v20 }
  0x2d   : > { %1445 = vmatprep.mubr.msk.f32.mxu0 %vm208_vm0, %v1301_v20  ;;  %1481 = vmatprep.mubr.msk.f32.mxu1 %vm208_vm0, %v1302_v22 }
  0x30   : > { %1446 = vmatmul.mubr.msk.f32.gmra.mrb[6].mxu0 %vm208_vm0, %v1302_v22  ;;  %1482 = vmatmul.mubr.msk.f32.gmra.mrb[6].mxu1 %vm208_vm0, %v1303_v23 }
  0x31   : > { %1486 = vmatprep.mubr.msk.f32.mxu0 %vm1582_vm2, %v1580_v31  ;;  %1491 = vmatprep.mubr.msk.f32.mxu1 %vm1582_vm2, %v1580_v31 }
  0xf7   : > { %v1438_v33 = vpop.f32.mrb[0].mxu0  ;;  %v1474_v35 = vpop.f32.mrb[0].mxu1 }
  0xf8   : > { %469 = vst.msk [vmem:[%s1709_s20 + $0x8] sm:$0xff] %vm467_vm3, %v1438_v33  ;;  %v477_v34 = vsel %vm467_vm3, %v1438_v33, 0.0  ;;  %v428_v36 = vpop.f32.mrb[1].mxu0  ;;  %1325 = vst.msk [vmem:[%s1709_s20 + $0x48] sm:$0xff] %vm467_vm3, %v1474_v35  ;;  %v791_v37 = vsel %vm467_vm3, %v1474_v35, 0.0  ;;  %v742_v39 = vpop.f32.mrb[1].mxu1 }
  0xf9   : > { %468 = vst.msk [vmem:[%s1709_s20] sm:$0xff] %vm467_vm3, %v428_v36  ;;  %v476_v38 = vsel %vm467_vm3, %v428_v36, 0.0  ;;  %1324 = vst.msk [vmem:[%s1709_s20 + $0x40] sm:$0xff] %vm467_vm3, %v742_v39  ;;  %v790_v41 = vsel %vm467_vm3, %v742_v39, 0.0 }
  0xfa   : > { %v478_v40 = vadd.f32 %v477_v34, %v476_v38  ;;  %v792_v42 = vadd.f32 %v791_v37, %v790_v41 }
  0xfb   : > { %v1441_v43 = vpop.f32.mrb[2].mxu0  ;;  %v1477_v44 = vpop.f32.mrb[2].mxu1 }
  0xfc   : > { %471 = vst.msk [vmem:[%s1709_s20 + $0x18] sm:$0xff] %vm467_vm3, %v1441_v43  ;;  %v438_v45 = vpop.f32.mrb[3].mxu0  ;;  %1327 = vst.msk [vmem:[%s1709_s20 + $0x58] sm:$0xff] %vm467_vm3, %v1477_v44  ;;  %v752_v47 = vpop.f32.mrb[3].mxu1  ;;  %v481_v50 = vsel %vm467_vm3, %v1441_v43, 0.0  ;;  %v795_v53 = vsel %vm467_vm3, %v1477_v44, 0.0 }
  0xfd   : > { %470 = vst.msk [vmem:[%s1709_s20 + $0x10] sm:$0xff] %vm467_vm3, %v438_v45  ;;  %v479_v46 = vsel %vm467_vm3, %v438_v45, 0.0  ;;  %1326 = vst.msk [vmem:[%s1709_s20 + $0x50] sm:$0xff] %vm467_vm3, %v752_v47  ;;  %v793_v49 = vsel %vm467_vm3, %v752_v47, 0.0 }
  0xfe   : > { %v480_v48 = vadd.f32 %v479_v46, %v478_v40  ;;  %v794_v51 = vadd.f32 %v793_v49, %v792_v42 }
  0xff   : > { %v1444_v52 = vpop.f32.mrb[4].mxu0  ;;  %v1480_v54 = vpop.f32.mrb[4].mxu1  ;;  %v918_v33 = vld [vmem:[%s1709_s20 + $0x8] sm:$0xff] }
 0x100   : > { %473 = vst.msk [vmem:[%s1709_s20 + $0x28] sm:$0xff] %vm467_vm3, %v1444_v52  ;;  %v448_v55 = vpop.f32.mrb[5].mxu0  ;;  %v482_v56 = vadd.f32 %v481_v50, %v480_v48  ;;  %1329 = vst.msk [vmem:[%s1709_s20 + $0x68] sm:$0xff] %vm467_vm3, %v1480_v54  ;;  %v762_v58 = vpop.f32.mrb[5].mxu1  ;;  %v796_v59 = vadd.f32 %v795_v53, %v794_v51  ;;  %v485_v62 = vsel %vm467_vm3, %v1444_v52, 0.0  ;;  %v799_v1 = vsel %vm467_vm3, %v1480_v54, 0.0 }
 0x101   : > { %472 = vst.msk [vmem:[%s1709_s20 + $0x20] sm:$0xff] %vm467_vm3, %v448_v55  ;;  %v483_v57 = vsel %vm467_vm3, %v448_v55, 0.0  ;;  %1328 = vst.msk [vmem:[%s1709_s20 + $0x60] sm:$0xff] %vm467_vm3, %v762_v58  ;;  %v797_v61 = vsel %vm467_vm3, %v762_v58, 0.0  ;;  %v917_v35 = vld [vmem:[%s1709_s20] sm:$0xff]  ;;  %v1336_v53 = vld [vmem:[%s1709_s20 + $0x48] sm:$0xff] }
 0x102   : > { %v484_v60 = vadd.f32 %v483_v57, %v482_v56  ;;  %v798_v63 = vadd.f32 %v797_v61, %v796_v59  ;;  %v1335_v54 = vld [vmem:[%s1709_s20 + $0x40] sm:$0xff] }
 0x103   : > { %v1447_v0 = vpop.f32.mrb[6].mxu0  ;;  %v1483_v2 = vpop.f32.mrb[6].mxu1  ;;  %v920_v36 = vld [vmem:[%s1709_s20 + $0x18] sm:$0xff] }
 0x104   : > { %475 = vst.msk [vmem:[%s1709_s20 + $0x38] sm:$0xff] %vm467_vm3, %v1447_v0  ;;  %v458_v3 = vpop.f32.mrb[7].mxu0  ;;  %v486_v4 = vadd.f32 %v485_v62, %v484_v60  ;;  %1331 = vst.msk [vmem:[%s1709_s20 + $0x78] sm:$0xff] %vm467_vm3, %v1483_v2  ;;  %v772_v6 = vpop.f32.mrb[7].mxu1  ;;  %v800_v7 = vadd.f32 %v799_v1, %v798_v63  ;;  %v489_v10 = vsel %vm467_vm3, %v1447_v0, 0.0  ;;  %v803_v12 = vsel %vm467_vm3, %v1483_v2, 0.0 }
 0x105   : > { %474 = vst.msk [vmem:[%s1709_s20 + $0x30] sm:$0xff] %vm467_vm3, %v458_v3  ;;  %v487_v5 = vsel %vm467_vm3, %v458_v3, 0.0  ;;  %1330 = vst.msk [vmem:[%s1709_s20 + $0x70] sm:$0xff] %vm467_vm3, %v772_v6  ;;  %v801_v9 = vsel %vm467_vm3, %v772_v6, 0.0  ;;  %v919_v37 = vld [vmem:[%s1709_s20 + $0x10] sm:$0xff]  ;;  %v1338_v59 = vld [vmem:[%s1709_s20 + $0x58] sm:$0xff] }
 0x106   : > { %v488_v8 = vadd.f32 %v487_v5, %v486_v4  ;;  %v802_v11 = vadd.f32 %v801_v9, %v800_v7  ;;  %v1337_v55 = vld [vmem:[%s1709_s20 + $0x50] sm:$0xff] }
 0x107   : > { %v922_v47 = vld [vmem:[%s1709_s20 + $0x28] sm:$0xff] }
 0x108   : > { %v490_v13 = vadd.f32 %v489_v10, %v488_v8  ;;  %v804_v14 = vadd.f32 %v803_v12, %v802_v11  ;;  %v921_v38 = vld [vmem:[%s1709_s20 + $0x20] sm:$0xff]  ;;  %v1340_v12 = vld [vmem:[%s1709_s20 + $0x68] sm:$0xff] }
 0x109   : > { %v1339_v4 = vld [vmem:[%s1709_s20 + $0x60] sm:$0xff] }
 0x10a   : > { %v491_v15 = vrot.slane %v490_v13, 4  ;;  %v805_v16 = vrot.slane %v804_v14, 4 }
 0x10b   : > { %v924_v60 = vld [vmem:[%s1709_s20 + $0x38] sm:$0xff] }
 0x10c   : > { %v492_v17 = vadd.f32 %v491_v15, %v490_v13  ;;  %v806_v18 = vadd.f32 %v805_v16, %v804_v14  ;;  %v923_v48 = vld [vmem:[%s1709_s20 + $0x30] sm:$0xff] }
 0x10e   : > { %v493_v19 = vrot.slane %v492_v17, 2  ;;  %v807_v20 = vrot.slane %v806_v18, 2 }
 0x110   : > { %v494_v21 = vadd.f32 %v493_v19, %v492_v17  ;;  %v808_v22 = vadd.f32 %v807_v20, %v806_v18  ;;  %v1351_v20 = vld [vmem:[%s1709_s20 + $0x70] sm:$0xff] }
 0x112   : > { %v495_v23 = vrot.slane %v494_v21, 1  ;;  %v809_v24 = vrot.slane %v808_v22, 1 }
 0x114   : > { %v496_v25 = vadd.f32 %v495_v23, %v494_v21  ;;  %v810_v26 = vadd.f32 %v809_v24, %v808_v22 }
 0x116   : > { %v811_v28 = vadd.f32 %v810_v26, %v496_v25 }
 0x118   : > { %1487 = vmatmul.mubr.msk.f32.vlgmr.msra.gmra.mrb[8].mxu0 %vm467_vm3, %v811_v28 }
 0x1eb   : > { %v912_v30 = vpop.f32.mrb[8].mxu0 }
 0x1ec   : > { %v916_v31 = vmul.f32 0.00390625, %v912_v30  ;;  %v1488_v32 = vpop.f32.mrb[9].mxu0  ;;  %v1352_v30 = vld [vmem:[%s1709_s20 + $0x78] sm:$0xff] }
 0x1ee   : > { %v928_v34 = vrot.slane %v916_v31, %v927_v29 }
 0x1f0   : > { %v1768_v39 = vsub.f32 %v917_v35, %v928_v34  ;;  %v1770_v40 = vsub.f32 %v918_v33, %v928_v34  ;;  %v1772_v41 = vsub.f32 %v919_v37, %v928_v34  ;;  %v1774_v42 = vsub.f32 %v920_v36, %v928_v34 }
 0x1f1   : > { %v1776_v43 = vsub.f32 %v921_v38, %v928_v34  ;;  %v1786_v49 = vsub.f32 %v922_v47, %v928_v34  ;;  %v1795_v56 = vsub.f32 %v923_v48, %v928_v34  ;;  %v1802_v62 = vsub.f32 %v1335_v54, %v928_v34 }
 0x1f2   : > { %v937_v44 = vmul.f32 %v1768_v39, %v1768_v39  ;;  %v938_v45 = vmul.f32 %v1770_v40, %v1770_v40  ;;  %v939_v46 = vmul.f32 %v1772_v41, %v1772_v41  ;;  %v940_v50 = vmul.f32 %v1774_v42, %v1774_v42 }
 0x1f3   : > { %v941_v57 = vmul.f32 %v1776_v43, %v1776_v43  ;;  %v1804_v63 = vsub.f32 %v1336_v53, %v928_v34  ;;  %v1806_v0 = vsub.f32 %v1337_v55, %v928_v34  ;;  %v1808_v1 = vsub.f32 %v924_v60, %v928_v34 }
 0x1f4   : > { %v945_v51 = vsel %vm467_vm3, %v937_v44, 0.0  ;;  %v946_v52 = vsel %vm467_vm3, %v938_v45, 0.0  ;;  %v948_v61 = vsel %vm467_vm3, %v939_v46, 0.0  ;;  %v1810_v3 = vsub.f32 %v1338_v59, %v928_v34 }
 0x1f5   : > { %v947_v58 = vadd.f32 %v946_v52, %v945_v51  ;;  %v942_v5 = vmul.f32 %v1786_v49, %v1786_v49  ;;  %v950_v6 = vsel %vm467_vm3, %v940_v50, 0.0  ;;  %v983_v7 = vmul.f32 %v1802_v62, %v1802_v62 }
 0x1f6   : > { %v984_v8 = vmul.f32 %v1804_v63, %v1804_v63  ;;  %v1820_v10 = vsub.f32 %v1339_v4, %v928_v34  ;;  %v985_v11 = vmul.f32 %v1806_v0, %v1806_v0  ;;  %v943_v13 = vmul.f32 %v1795_v56, %v1795_v56 }
 0x1f7   : > { %v949_v2 = vadd.f32 %v948_v61, %v947_v58  ;;  %v952_v14 = vsel %vm467_vm3, %v941_v57, 0.0  ;;  %v991_v15 = vsel %vm467_vm3, %v983_v7, 0.0  ;;  %v1829_v17 = vsub.f32 %v1340_v12, %v928_v34 }
 0x1f8   : > { %v986_v18 = vmul.f32 %v1810_v3, %v1810_v3  ;;  %v992_v19 = vsel %vm467_vm3, %v984_v8, 0.0  ;;  %v944_v21 = vmul.f32 %v1808_v1, %v1808_v1  ;;  %v954_v22 = vsel %vm467_vm3, %v942_v5, 0.0 }
 0x1f9   : > { %v951_v9 = vadd.f32 %v950_v6, %v949_v2  ;;  %v993_v23 = vadd.f32 %v992_v19, %v991_v15  ;;  %v1838_v25 = vsub.f32 %v1351_v20, %v928_v34  ;;  %v987_v26 = vmul.f32 %v1820_v10, %v1820_v10 }
 0x1fa   : > { %v994_v28 = vsel %vm467_vm3, %v985_v11, 0.0  ;;  %v956_v31 = vsel %vm467_vm3, %v943_v13, 0.0  ;;  %v1845_v35 = vsub.f32 %v1352_v30, %v928_v34  ;;  %v988_v36 = vmul.f32 %v1829_v17, %v1829_v17 }
 0x1fb   : > { %v953_v16 = vadd.f32 %v952_v14, %v951_v9  ;;  %v995_v32 = vadd.f32 %v994_v28, %v993_v23  ;;  %v996_v37 = vsel %vm467_vm3, %v986_v18, 0.0  ;;  %v958_v38 = vsel %vm467_vm3, %v944_v21, 0.0 }
 0x1fc   : > { %v989_v46 = vmul.f32 %v1838_v25, %v1838_v25  ;;  %v998_v47 = vsel %vm467_vm3, %v987_v26, 0.0  ;;  %v990_v34 = vmul.f32 %v1845_v35, %v1845_v35  ;;  %v1000_v51 = vsel %vm467_vm3, %v988_v36, 0.0 }
 0x1fd   : > { %v955_v24 = vadd.f32 %v954_v22, %v953_v16  ;;  %v997_v44 = vadd.f32 %v996_v37, %v995_v32 }
 0x1fe   : > { %v1002_v54 = vsel %vm467_vm3, %v989_v46, 0.0  ;;  %v1004_v58 = vsel %vm467_vm3, %v990_v34, 0.0 }
 0x1ff   : > { %v957_v33 = vadd.f32 %v956_v31, %v955_v24  ;;  %v999_v48 = vadd.f32 %v998_v47, %v997_v44 }
 0x201   : > { %v959_v45 = vadd.f32 %v958_v38, %v957_v33  ;;  %v1001_v52 = vadd.f32 %v1000_v51, %v999_v48 }
 0x203   : > { %v960_v50 = vrot.slane %v959_v45, 4  ;;  %v1003_v55 = vadd.f32 %v1002_v54, %v1001_v52 }
 0x205   : > { %v961_v53 = vadd.f32 %v960_v50, %v959_v45  ;;  %v1005_v59 = vadd.f32 %v1004_v58, %v1003_v55 }
 0x207   : > { %v962_v57 = vrot.slane %v961_v53, 2  ;;  %v1006_v61 = vrot.slane %v1005_v59, 4 }
 0x209   : > { %v963_v60 = vadd.f32 %v962_v57, %v961_v53  ;;  %v1007_v2 = vadd.f32 %v1006_v61, %v1005_v59 }
 0x20b   : > { %v964_v4 = vrot.slane %v963_v60, 1  ;;  %v1008_v5 = vrot.slane %v1007_v2, 2 }
 0x20d   : > { %v1009_v6 = vadd.f32 %v1008_v5, %v1007_v2  ;;  %v965_v7 = vadd.f32 %v964_v4, %v963_v60 }
 0x20f   : > { %v1010_v8 = vrot.slane %v1009_v6, 1 }
 0x211   : > { %v1011_v9 = vadd.f32 %v1010_v8, %v1009_v6 }
 0x213   : > { %v1012_v11 = vadd.f32 %v1011_v9, %v965_v7 }
 0x215   : > { %1492 = vmatmul.mubr.msk.f32.vlgmr.msra.gmra.mrb[8].mxu1 %vm467_vm3, %v1012_v11 }
 0x2e8   : > { %v1082_v12 = vpop.f32.mrb[8].mxu1 }
 0x2e9   : > { %v1086_v13 = vmul.f32 0.00390625, %v1082_v12  ;;  %v1493_v14 = vpop.f32.mrb[9].mxu1 }
 0x2eb   : > { %v1087_v15 = vadd.f32 1e-05, %v1086_v13 }
 0x2ed   : > { %1554 = vrsqrt.f32 %v1087_v15 }
 0x2f7   : > { %v1555_v16 = vpop.eup %1554 }
 0x2f8   : > { %v1092_v18 = vrot.slane %v1555_v16, %v927_v29 }
 0x2fa   : > { %v1093_v19 = vmul.f32 %v1092_v18, %v1768_v39  ;;  %v1094_v20 = vmul.f32 %v1092_v18, %v1770_v40  ;;  %v1095_v21 = vmul.f32 %v1092_v18, %v1772_v41  ;;  %v1096_v22 = vmul.f32 %v1092_v18, %v1774_v42 }
 0x2fb   : > { %v1097_v23 = vmul.f32 %v1092_v18, %v1776_v43  ;;  %v1098_v24 = vmul.f32 %v1092_v18, %v1786_v49  ;;  %v1099_v26 = vmul.f32 %v1092_v18, %v1795_v56  ;;  %v1100_v27 = vmul.f32 %v1092_v18, %v1808_v1 }
 0x2fc   : > { %v1101_v29 = vmax.f32 %v1093_v19, 0.0  ;;  %v1102_v39 = vmax.f32 %v1094_v20, 0.0  ;;  %v1103_v40 = vmax.f32 %v1095_v21, 0.0  ;;  %v1104_v28 = vmax.f32 %v1096_v22, 0.0 }
 0x2fd   : > { %v1105_v41 = vmax.f32 %v1097_v23, 0.0  ;;  %v1106_v30 = vmax.f32 %v1098_v24, 0.0  ;;  %v1107_v42 = vmax.f32 %v1099_v26, 0.0  ;;  %v1108_v31 = vmax.f32 %v1100_v27, 0.0 }
 0x2fe   : > { %1109 = vst.msk [vmem:[%s1709_s20] sm:$0xff] %vm467_vm3, %v1101_v29  ;;  %1110 = vst.msk [vmem:[%s1709_s20 + $0x8] sm:$0xff] %vm467_vm3, %v1102_v39  ;;  %v1133_v43 = vmul.f32 %v1092_v18, %v1802_v62  ;;  %v1134_v49 = vmul.f32 %v1092_v18, %v1804_v63  ;;  %v1135_v56 = vmul.f32 %v1092_v18, %v1806_v0 }
 0x2ff   : > { %1111 = vst.msk [vmem:[%s1709_s20 + $0x10] sm:$0xff] %vm467_vm3, %v1103_v40  ;;  %1112 = vst.msk [vmem:[%s1709_s20 + $0x18] sm:$0xff] %vm467_vm3, %v1104_v28  ;;  %v1136_v1 = vmul.f32 %v1092_v18, %v1810_v3  ;;  %v1137_v62 = vmul.f32 %v1092_v18, %v1820_v10  ;;  %v1138_v63 = vmul.f32 %v1092_v18, %v1829_v17 }
 0x300   : > { %1113 = vst.msk [vmem:[%s1709_s20 + $0x20] sm:$0xff] %vm467_vm3, %v1105_v41  ;;  %1114 = vst.msk [vmem:[%s1709_s20 + $0x28] sm:$0xff] %vm467_vm3, %v1106_v30  ;;  %v1139_v0 = vmul.f32 %v1092_v18, %v1838_v25  ;;  %v1140_v3 = vmul.f32 %v1092_v18, %v1845_v35  ;;  %v1141_v32 = vmax.f32 %v1133_v43, 0.0  ;;  %v1142_v33 = vmax.f32 %v1134_v49, 0.0 }
 0x301   : > { %1115 = vst.msk [vmem:[%s1709_s20 + $0x30] sm:$0xff] %vm467_vm3, %v1107_v42  ;;  %1116 = vst.msk [vmem:[%s1709_s20 + $0x38] sm:$0xff] %vm467_vm3, %v1108_v31  ;;  %v1143_v36 = vmax.f32 %v1135_v56, 0.0  ;;  %v1144_v37 = vmax.f32 %v1136_v1, 0.0  ;;  %v1145_v38 = vmax.f32 %v1137_v62, 0.0  ;;  %v1146_v44 = vmax.f32 %v1138_v63, 0.0 }
 0x302   : > { %v1147_v45 = vmax.f32 %v1139_v0, 0.0  ;;  %v1148_v46 = vmax.f32 %v1140_v3, 0.0  ;;  %1353 = vst.msk [vmem:[%s1709_s20 + $0x40] sm:$0xff] %vm467_vm3, %v1141_v32  ;;  %1354 = vst.msk [vmem:[%s1709_s20 + $0x48] sm:$0xff] %vm467_vm3, %v1142_v33 }
 0x303   : > { %1355 = vst.msk [vmem:[%s1709_s20 + $0x50] sm:$0xff] %vm467_vm3, %v1143_v36  ;;  %1356 = vst.msk [vmem:[%s1709_s20 + $0x58] sm:$0xff] %vm467_vm3, %v1144_v37 }
 0x304   : > { %1357 = vst.msk [vmem:[%s1709_s20 + $0x60] sm:$0xff] %vm467_vm3, %v1145_v38  ;;  %1358 = vst.msk [vmem:[%s1709_s20 + $0x68] sm:$0xff] %vm467_vm3, %v1146_v44 }
 0x305   : > { %1359 = vst.msk [vmem:[%s1709_s20 + $0x70] sm:$0xff] %vm467_vm3, %v1147_v45  ;;  %1360 = vst.msk [vmem:[%s1709_s20 + $0x78] sm:$0xff] %vm467_vm3, %v1148_v46 }
 0x306 PF: > { %s12_s11 = sadd.s32 1, %s1578_s11   ;;  %s1922_s9 = smov %s1574_s10 }
 0x307   : > { %p9_p5 = scmp.ge.s32.totalorder %s12_s11, 4   ;;  %s1923_s10 = smov %s1925_s12 }
 0x309   :  { %11 = sbr.rel (!%p9_p5) target bundleno = 2 (0x2), region = 67 }

</bundles_post_ra>
